<compile_context>
chip_gen: v6e
topology: v6e:2x2x1
jax: 0.10.0
libtpu: 0.0.40
codegen_flags: <defaults>
</compile_context>

<pallas_src>
import math

import jax
import jax.numpy as jnp
from jax.experimental import pallas as pl
from jax.experimental.pallas import tpu as pltpu

# Tile targets (bf16 operands, f32 accumulator; (8,128)-aligned; fits v7x 64 MiB VMEM).
TILE_M = 512
TILE_N = 512
TILE_K = 512
LN_EPS = 1e-12          # BERT layer_norm_eps


def _tile(dim, target, align):
    """Largest `align`-multiple block <= target that divides `dim`; full dim if small
    or if no aligned divisor exists (block == full dim is always a legal BlockSpec)."""
    if dim <= target:
        return dim
    cand = target - (target % align)
    while cand >= align:
        if dim % cand == 0:
            return cand
        cand -= align
    return dim


def _apply_activation(y, activation):
    # y is f32; keep all elementwise math in f32 (v5e VPU/EUP have no bf16 path).
    if activation == "gelu":
        # TODO(synk): HF BERT uses exact erf-GELU; tanh approximation used here for
        # guaranteed TPU lowering (numerically very close).
        c = math.sqrt(2.0 / math.pi)
        return 0.5 * y * (1.0 + jnp.tanh(c * (y + 0.044715 * y * y * y)))
    if activation == "tanh":
        return jnp.tanh(y)
    return y


# ----------------------------- tiled matmul (+bias, +activation) -----------------------------

def _make_matmul_kernel(activation, has_bias):
    def body(x_ref, w_ref, b_ref, o_ref, acc_ref):
        k_idx = pl.program_id(2)

        @pl.when(k_idx == 0)
        def _():
            acc_ref[...] = jnp.zeros_like(acc_ref)

        acc_ref[...] += jnp.dot(x_ref[...], w_ref[...],
                                preferred_element_type=jnp.float32)

        @pl.when(k_idx == pl.num_programs(2) - 1)
        def _():
            y = acc_ref[...]                               # f32
            if b_ref is not None:
                y = y + b_ref[...]                         # bias kept in f32
            o_ref[...] = _apply_activation(y, activation).astype(o_ref.dtype)

    if has_bias:
        def kernel(x_ref, w_ref, b_ref, o_ref, acc_ref):
            body(x_ref, w_ref, b_ref, o_ref, acc_ref)
    else:
        def kernel(x_ref, w_ref, o_ref, acc_ref):
            body(x_ref, w_ref, None, o_ref, acc_ref)
    return kernel


def linear(x, w, b=None, activation="none", out_dtype=jnp.bfloat16):
    """y = act(x @ w [+ b]); x/w bf16 on the MXU, f32 VMEM accumulator, bf16 output."""
    M, K = x.shape
    N = w.shape[1]
    tm = _tile(M, TILE_M, 8)
    tn = _tile(N, TILE_N, 128)
    tk = _tile(K, TILE_K, 128)
    grid = (M // tm, N // tn, K // tk)

    in_specs = [
        pl.BlockSpec((tm, tk), lambda i, j, k: (i, k)),
        # TODO(synk): pipeline_mode=pl.Buffered(3) on this weight stream if the profile
        # shows exposed DMA on the K axis (mostly relevant on v5e's lower HBM BW).
        pl.BlockSpec((tk, tn), lambda i, j, k: (k, j)),
    ]
    args = [x, w]
    if b is not None:
        in_specs.append(pl.BlockSpec((1, tn), lambda i, j, k: (0, j)))
        args.append(b.reshape(1, N).astype(jnp.float32))

    return pl.pallas_call(
        _make_matmul_kernel(activation, b is not None),
        out_shape=jax.ShapeDtypeStruct((M, N), out_dtype),
        grid=grid,
        in_specs=in_specs,
        out_specs=pl.BlockSpec((tm, tn), lambda i, j, k: (i, j)),
        scratch_shapes=[pltpu.VMEM((tm, tn), jnp.float32)],
        compiler_params=pltpu.CompilerParams(
            dimension_semantics=("parallel", "parallel", "arbitrary")),
    )(*args)


# ----------------------- fused matmul + bias + residual + layernorm -----------------------

def _matmul_residual_ln_kernel(x_ref, w_ref, b_ref, r_ref, g_ref, be_ref, o_ref, acc_ref):
    k_idx = pl.program_id(1)

    @pl.when(k_idx == 0)
    def _():
        acc_ref[...] = jnp.zeros_like(acc_ref)

    acc_ref[...] += jnp.dot(x_ref[...], w_ref[...], preferred_element_type=jnp.float32)

    @pl.when(k_idx == pl.num_programs(1) - 1)
    def _():
        # Epilogue entirely in f32 (bias, residual add, LN stats).
        y = acc_ref[...] + b_ref[...] + r_ref[...].astype(jnp.float32)
        mu = jnp.mean(y, axis=-1, keepdims=True)
        var = jnp.mean((y - mu) ** 2, axis=-1, keepdims=True)
        inv = jax.lax.rsqrt(var + LN_EPS)
        o_ref[...] = (((y - mu) * inv) * g_ref[...] + be_ref[...]).astype(o_ref.dtype)


def linear_residual_layernorm(x, w, b, residual, gamma, beta, out_dtype=jnp.bfloat16):
    """out = LayerNorm(x @ w + b + residual).  N (= hidden) is kept whole so the LN
    reduction stays in one block; M and K are tiled, K is the reduction ("arbitrary") axis."""
    M, K = x.shape
    N = w.shape[1]
    tm = _tile(M, TILE_M, 8)
    tk = _tile(K, TILE_K, 128)
    grid = (M // tm, K // tk)

    return pl.pallas_call(
        _matmul_residual_ln_kernel,
        out_shape=jax.ShapeDtypeStruct((M, N), out_dtype),
        grid=grid,
        in_specs=[
            pl.BlockSpec((tm, tk), lambda i, k: (i, k)),
            pl.BlockSpec((tk, N), lambda i, k: (k, 0)),
            pl.BlockSpec((1, N), lambda i, k: (0, 0)),
            pl.BlockSpec((tm, N), lambda i, k: (i, 0)),
            pl.BlockSpec((1, N), lambda i, k: (0, 0)),
            pl.BlockSpec((1, N), lambda i, k: (0, 0)),
        ],
        out_specs=pl.BlockSpec((tm, N), lambda i, k: (i, 0)),
        scratch_shapes=[pltpu.VMEM((tm, N), jnp.float32)],
        compiler_params=pltpu.CompilerParams(
            dimension_semantics=("parallel", "arbitrary")),
    )(x, w, b.reshape(1, N).astype(jnp.float32), residual,
      gamma.reshape(1, N).astype(jnp.float32), beta.reshape(1, N).astype(jnp.float32))


# ----------------------------- layernorm (no residual, row-tiled) -----------------------------

def _layernorm_kernel(x_ref, g_ref, b_ref, o_ref):
    x = x_ref[...].astype(jnp.float32)
    mu = jnp.mean(x, axis=-1, keepdims=True)
    var = jnp.mean((x - mu) ** 2, axis=-1, keepdims=True)
    inv = jax.lax.rsqrt(var + LN_EPS)
    o_ref[...] = (((x - mu) * inv) * g_ref[...] + b_ref[...]).astype(o_ref.dtype)


def layernorm(x, gamma, beta, out_dtype=jnp.bfloat16):
    M, H = x.shape
    tm = _tile(M, TILE_M, 8)
    return pl.pallas_call(
        _layernorm_kernel,
        out_shape=jax.ShapeDtypeStruct((M, H), out_dtype),
        grid=(M // tm,),
        in_specs=[
            pl.BlockSpec((tm, H), lambda i: (i, 0)),
            pl.BlockSpec((1, H), lambda i: (0, 0)),
            pl.BlockSpec((1, H), lambda i: (0, 0)),
        ],
        out_specs=pl.BlockSpec((tm, H), lambda i: (i, 0)),
        compiler_params=pltpu.CompilerParams(dimension_semantics=("parallel",)),
    )(x, gamma.reshape(1, H).astype(jnp.float32), beta.reshape(1, H).astype(jnp.float32))


# ----------------------------- attention (all heads per grid step) -----------------------------

def _make_attention_kernel(n_heads, hidden):
    def kernel(qkv_ref, bias_ref, o_ref):
        H = hidden
        Dh = H // n_heads
        scale = 1.0 / math.sqrt(Dh)
        qkv = qkv_ref[...]                       # (S, 3H) bf16: [Q | K | V] packed on lanes
        bias = bias_ref[...]                     # (1, S) f32 additive key mask (0 or -10000)
        # TODO(synk): for long sequences (S >= ~1024) switch to flash-style online softmax
        # tiled over KV blocks (and grid over (B, head_group)) to keep VMEM flat; raise
        # vmem_limit_bytes on v5e/v7x if the (S,S) score matrices approach the scoped limit.
        for h in range(n_heads):
            q = qkv[:, h * Dh:(h + 1) * Dh]
            k = qkv[:, H + h * Dh:H + (h + 1) * Dh]
            v = qkv[:, 2 * H + h * Dh:2 * H + (h + 1) * Dh]
            # Contract the last dim of both operands: no explicit K transpose on the XLU.
            s = jax.lax.dot_general(
                q, k, dimension_numbers=(((1,), (1,)), ((), ())),
                preferred_element_type=jnp.float32)
            s = s * scale + bias                 # f32 softmax
            s = s - jnp.max(s, axis=-1, keepdims=True)
            p = jnp.exp(s)
            p = p * pl.reciprocal(jnp.sum(p, axis=-1, keepdims=True), approx=True)
            ctx_h = jnp.dot(p.astype(jnp.bfloat16), v, preferred_element_type=jnp.float32)
            # Direct per-head store into the output slice (no jnp.concatenate copy).
            o_ref[:, h * Dh:(h + 1) * Dh] = ctx_h.astype(o_ref.dtype)
    return kernel


def attention(qkv, mask_bias, n_heads, hidden):
    # qkv: [B, S, 3H] bf16; mask_bias: [B, 1, S] f32 additive mask. Output: [B, S, H] bf16.
    B, S, H3 = qkv.shape
    return pl.pallas_call(
        _make_attention_kernel(n_heads, hidden),
        out_shape=jax.ShapeDtypeStruct((B, S, hidden), jnp.bfloat16),
        grid=(B,),
        in_specs=[
            pl.BlockSpec((None, S, H3), lambda b: (b, 0, 0)),
            pl.BlockSpec((None, 1, S), lambda b: (b, 0, 0)),
        ],
        out_specs=pl.BlockSpec((None, S, hidden), lambda b: (b, 0, 0)),
        compiler_params=pltpu.CompilerParams(dimension_semantics=("parallel",)),
    )(qkv, mask_bias)


# ----------------------------- fused pooler + projection head -----------------------------

def _pooler_kernel(cls_ref, wp_ref, bp_ref, o_ref):
    y = jnp.dot(cls_ref[...], wp_ref[...], preferred_element_type=jnp.float32) + bp_ref[...]
    o_ref[...] = jnp.tanh(y).astype(o_ref.dtype)


def _pooler_proj_kernel(cls_ref, wp_ref, bp_ref, wj_ref, o_ref):
    y = jnp.dot(cls_ref[...], wp_ref[...], preferred_element_type=jnp.float32) + bp_ref[...]
    pooled = jnp.tanh(y).astype(jnp.bfloat16)
    o_ref[...] = jnp.dot(pooled, wj_ref[...], preferred_element_type=jnp.float32).astype(o_ref.dtype)


def pooler_and_projection(cls_tok, pool_w, pool_b, proj_w):
    """pooled = tanh(cls @ Wp + bp); optional bias-free projection. One tiny pallas_call
    (M = batch rows; two separate launches here would be pure ramp overhead)."""
    B, H = cls_tok.shape
    bp = pool_b.reshape(1, H).astype(jnp.float32)
    if proj_w is None:
        return pl.pallas_call(
            _pooler_kernel,
            out_shape=jax.ShapeDtypeStruct((B, H), jnp.float32),
            grid=(1,),
            in_specs=[
                pl.BlockSpec((B, H), lambda i: (0, 0)),
                pl.BlockSpec((H, H), lambda i: (0, 0)),
                pl.BlockSpec((1, H), lambda i: (0, 0)),
            ],
            out_specs=pl.BlockSpec((B, H), lambda i: (0, 0)),
        )(cls_tok, pool_w, bp)
    P = proj_w.shape[1]
    return pl.pallas_call(
        _pooler_proj_kernel,
        out_shape=jax.ShapeDtypeStruct((B, P), jnp.float32),
        grid=(1,),
        in_specs=[
            pl.BlockSpec((B, H), lambda i: (0, 0)),
            pl.BlockSpec((H, H), lambda i: (0, 0)),
            pl.BlockSpec((1, H), lambda i: (0, 0)),
            pl.BlockSpec((H, P), lambda i: (0, 0)),
        ],
        out_specs=pl.BlockSpec((B, P), lambda i: (0, 0)),
    )(cls_tok, pool_w, bp, proj_w)


# ----------------------------- Model (glue + params) -----------------------------

class Config:
    vocab_size = 100
    type_vocab_size = 2
    max_position = 32
    hidden = 32
    heads = 4
    intermediate = 64
    layers = 2
    proj_dim = 16        # BERT(proj_dim=...) projection head (bias=False)


def init_params(key, cfg):
    def nrm(k, shape, scale=0.02, dtype=jnp.float32):
        return (scale * jax.random.normal(k, shape)).astype(dtype)

    keys = iter(jax.random.split(key, 8 + cfg.layers * 16))
    H, I = cfg.hidden, cfg.intermediate
    params = {
        # Embedding tables / LN params stay f32 (gather + LN math in f32).
        "word_emb": nrm(next(keys), (cfg.vocab_size, H)),
        "pos_emb": nrm(next(keys), (cfg.max_position, H)),
        "type_emb": nrm(next(keys), (cfg.type_vocab_size, H)),
        "emb_ln_g": jnp.ones((H,), jnp.float32),
        "emb_ln_b": jnp.zeros((H,), jnp.float32),
        # Matmul weights stored in bf16 (MXU-native); biases / LN params in f32.
        "pool_w": nrm(next(keys), (H, H), dtype=jnp.bfloat16),
        "pool_b": jnp.zeros((H,), jnp.float32),
        "proj_w": nrm(next(keys), (H, cfg.proj_dim), dtype=jnp.bfloat16),  # bias=False
        "layers": [],
    }
    for _ in range(cfg.layers):
        wq = nrm(next(keys), (H, H))
        wk = nrm(next(keys), (H, H))
        wv = nrm(next(keys), (H, H))
        lp = {
            # Q/K/V fused into one [H, 3H] bf16 weight -> one MXU matmul per layer.
            "w_qkv": jnp.concatenate([wq, wk, wv], axis=1).astype(jnp.bfloat16),
            "b_qkv": jnp.zeros((3 * H,), jnp.float32),
            "wo": nrm(next(keys), (H, H), dtype=jnp.bfloat16), "bo": jnp.zeros((H,), jnp.float32),
            "ln1_g": jnp.ones((H,), jnp.float32), "ln1_b": jnp.zeros((H,), jnp.float32),
            "wi": nrm(next(keys), (H, I), dtype=jnp.bfloat16), "bi": jnp.zeros((I,), jnp.float32),
            "wf": nrm(next(keys), (I, H), dtype=jnp.bfloat16), "bf": jnp.zeros((H,), jnp.float32),
            "ln2_g": jnp.ones((H,), jnp.float32), "ln2_b": jnp.zeros((H,), jnp.float32),
        }
        params["layers"].append(lp)
    return params


def bert_forward(params, cfg, input_ids, attention_mask=None, token_type_ids=None):
    """Equivalent of BERT.forward(...): returns pooler_output (optionally projected)."""
    B, S = input_ids.shape
    H = cfg.hidden

    if attention_mask is None:
        attention_mask = jnp.ones((B, S), jnp.float32)
    if token_type_ids is None:
        token_type_ids = jnp.zeros((B, S), jnp.int32)

    # --- embeddings (gather is glue, not the hot path) ---
    emb = (params["word_emb"][input_ids]
           + params["pos_emb"][jnp.arange(S)][None, :, :]
           + params["type_emb"][token_type_ids])
    # LN in f32, output carried forward in bf16.
    h = layernorm(emb.reshape(B * S, H), params["emb_ln_g"], params["emb_ln_b"])

    # HF-style extended attention mask: 0 where attended, -10000 where masked (f32).
    mask_bias = ((1.0 - attention_mask.astype(jnp.float32)) * -10000.0).reshape(B, 1, S)

    for lp in params["layers"]:
        # fused QKV projection: one bf16 [B*S, H] @ [H, 3H] matmul
        qkv = linear(h, lp["w_qkv"], lp["b_qkv"])
        # attention: heads split/merged inside the kernel (no transpose glue in HBM)
        ctx = attention(qkv.reshape(B, S, 3 * H), mask_bias, cfg.heads, H)
        ctx = ctx.reshape(B * S, H)
        # attention output projection + residual + LN fused into one kernel
        h = linear_residual_layernorm(ctx, lp["wo"], lp["bo"], h, lp["ln1_g"], lp["ln1_b"])
        # FFN up-projection with GELU epilogue (GELU in f32, output bf16)
        inter = linear(h, lp["wi"], lp["bi"], activation="gelu")
        # FFN down-projection + residual + LN fused into one kernel
        h = linear_residual_layernorm(inter, lp["wf"], lp["bf"], h, lp["ln2_g"], lp["ln2_b"])

    seq_out = h.reshape(B, S, H)
    cls = seq_out[:, 0, :]                                       # [B, H] bf16
    # fused pooler (tanh) + bias-free projection head in one tiny kernel
    return pooler_and_projection(cls, params["pool_w"], params["pool_b"],
                                 params.get("proj_w"))


if __name__ == "__main__":
    cfg = Config()
    key = jax.random.PRNGKey(0)
    kp, kid, kmask = jax.random.split(key, 3)

    params = init_params(kp, cfg)

    batch, seq = 2, 8
    input_ids = jax.random.randint(kid, (batch, seq), 0, cfg.vocab_size, dtype=jnp.int32)
    attention_mask = jnp.ones((batch, seq), jnp.float32).at[1, 6:].set(0.0)  # pad tail of sample 1
    token_type_ids = jnp.zeros((batch, seq), jnp.int32)

    out = bert_forward(params, cfg, input_ids, attention_mask, token_type_ids)
    out = jax.block_until_ready(out)
    assert out.shape == (batch, cfg.proj_dim)
    assert bool(jnp.all(jnp.isfinite(out)))
    print("KERNEL_OK")
</pallas_src>

<mosaic_0001>
module attributes {stable_mosaic.version = 11 : i64} {
  func.func @_layernorm_kernel(%arg0: i32, %arg1: memref<16x32xf32, #tpu.memory_space<vmem>>, %arg2: memref<1x32xf32, #tpu.memory_space<vmem>>, %arg3: memref<1x32xf32, #tpu.memory_space<vmem>>, %arg4: memref<16x32xbf16, #tpu.memory_space<vmem>>) attributes {dimension_semantics = [#tpu.dimension_semantics<parallel>], iteration_bounds = array<i64: 1>, scalar_prefetch = 0 : i64, scratch_operands = 0 : i64, tpu.core_type = #tpu.core_type<tc>, window_params = [{transform_indices = @transform_0, window_bounds = array<i64: 16, 32>}, {pipeline_mode = #tpu.pipeline_mode<synchronous>, transform_indices = @transform_1, window_bounds = array<i64: 1, 32>}, {pipeline_mode = #tpu.pipeline_mode<synchronous>, transform_indices = @transform_2, window_bounds = array<i64: 1, 32>}, {transform_indices = @transform_3, window_bounds = array<i64: 16, 32>}]} {
    %c0 = arith.constant 0 : index
    %c0_0 = arith.constant 0 : index
    %0 = vector.load %arg1[%c0, %c0_0] : memref<16x32xf32, #tpu.memory_space<vmem>>, vector<16x32xf32>
    %cst = arith.constant dense<0.000000e+00> : vector<16xf32>
    %1 = vector.multi_reduction <add>, %0, %cst [1] : vector<16x32xf32> to vector<16xf32>
    %2 = vector.shape_cast %1 : vector<16xf32> to vector<16x1xf32>
    %cst_1 = arith.constant 3.200000e+01 : f32
    %3 = vector.broadcast %cst_1 : f32 to vector<16x1xf32>
    %4 = arith.divf %2, %3 : vector<16x1xf32>
    %5 = vector.broadcast %4 : vector<16x1xf32> to vector<16x32xf32>
    %6 = arith.subf %0, %5 : vector<16x32xf32>
    %7 = arith.mulf %6, %6 : vector<16x32xf32>
    %cst_2 = arith.constant dense<0.000000e+00> : vector<16xf32>
    %8 = vector.multi_reduction <add>, %7, %cst_2 [1] : vector<16x32xf32> to vector<16xf32>
    %9 = vector.shape_cast %8 : vector<16xf32> to vector<16x1xf32>
    %cst_3 = arith.constant 3.200000e+01 : f32
    %10 = vector.broadcast %cst_3 : f32 to vector<16x1xf32>
    %11 = arith.divf %9, %10 : vector<16x1xf32>
    %cst_4 = arith.constant 9.99999996E-13 : f32
    %12 = vector.broadcast %cst_4 : f32 to vector<16x1xf32>
    %13 = arith.addf %11, %12 : vector<16x1xf32>
    %14 = math.rsqrt %13 : vector<16x1xf32>
    %15 = vector.broadcast %4 : vector<16x1xf32> to vector<16x32xf32>
    %16 = arith.subf %0, %15 : vector<16x32xf32>
    %17 = vector.broadcast %14 : vector<16x1xf32> to vector<16x32xf32>
    %18 = arith.mulf %16, %17 : vector<16x32xf32>
    %c0_5 = arith.constant 0 : index
    %c0_6 = arith.constant 0 : index
    %19 = vector.load %arg2[%c0_5, %c0_6] : memref<1x32xf32, #tpu.memory_space<vmem>>, vector<1x32xf32>
    %20 = vector.broadcast %19 : vector<1x32xf32> to vector<16x32xf32>
    %21 = arith.mulf %18, %20 : vector<16x32xf32>
    %c0_7 = arith.constant 0 : index
    %c0_8 = arith.constant 0 : index
    %22 = vector.load %arg3[%c0_7, %c0_8] : memref<1x32xf32, #tpu.memory_space<vmem>>, vector<1x32xf32>
    %23 = vector.broadcast %22 : vector<1x32xf32> to vector<16x32xf32>
    %24 = arith.addf %21, %23 : vector<16x32xf32>
    %25 = arith.truncf %24 : vector<16x32xf32> to vector<16x32xbf16>
    %c0_9 = arith.constant 0 : index
    %c0_10 = arith.constant 0 : index
    %26 = vector.load %arg4[%c0_9, %c0_10] : memref<16x32xbf16, #tpu.memory_space<vmem>>, vector<16x32xbf16>
    tpu.vector_store %arg4[%c0_9, %c0_10], %25 {strides = array<i32>} : memref<16x32xbf16, #tpu.memory_space<vmem>>, vector<16x32xbf16>,
    return
  }
  func.func @transform_0(%arg0: i32) -> (i32, i32) {
    %c0_i32 = arith.constant 0 : i32
    %c0_i32_0 = arith.constant 0 : i32
    return %arg0, %c0_i32 : i32, i32
  }
  func.func @transform_1(%arg0: i32) -> (i32, i32) {
    %c0_i32 = arith.constant 0 : i32
    %c0_i32_0 = arith.constant 0 : i32
    %c0_i32_1 = arith.constant 0 : i32
    return %c0_i32, %c0_i32_0 : i32, i32
  }
  func.func @transform_2(%arg0: i32) -> (i32, i32) {
    %c0_i32 = arith.constant 0 : i32
    %c0_i32_0 = arith.constant 0 : i32
    %c0_i32_1 = arith.constant 0 : i32
    return %c0_i32, %c0_i32_0 : i32, i32
  }
  func.func @transform_3(%arg0: i32) -> (i32, i32) {
    %c0_i32 = arith.constant 0 : i32
    %c0_i32_0 = arith.constant 0 : i32
    return %arg0, %c0_i32 : i32, i32
  }
}

</mosaic_0001>

<bundles_post_ra>
// kernel: tpu_custom_call.1
= control target key start
LH: loop header
LB: loop body
LE: loop exit
PB: predicated region body
PF: predicated region fallthrough
CT: control target
= control target key end

     0   :  { %8 = vsyncpa [#allocation3], 0  ;;  %s207_s0 = inlined_call_operand.hbm [shape: f32[16,32], index: 0, kind: input, shape index: {}]   ;;  %s208_s1 = inlined_call_operand.vmem [shape: f32[1,32], index: 1, kind: input, shape index: {}]   ;;  %s209_s2 = inlined_call_operand.vmem [shape: f32[1,32], index: 2, kind: input, shape index: {}]   ;;  %s210_s3 = inlined_call_operand.hbm [shape: bf16[16,32], index: 3, kind: output, shape index: {}]  }
   0x1   :  { %9 = vsyncpa [#allocation4], 0  ;;  %s165_s12 = smov [#allocation2]  }
   0x2   :  { %s15_s13 = sshll.u32 %s165_s12, 4  ;;  %s16_s13 = int_to_ptr.vmem [resolvable:$true] %s15_s13 }
   0x3   :  { %s129_s14 = scalar_lea.vmem %s16_s13, 256  ;;  %p134_p1 = scmp.lt.s32.totalorder %s16_s13, %s16_s13 }
   0x4   :  { %p130_p0 = scmp.ne.s32.totalorder %s16_s13, %s129_s14  ;;  %p135_p2 = scmp.lt.s32.totalorder %s129_s14, %s129_s14 }
   0x6   :  { %p136_p3 = por %p135_p2, %p134_p1 }
   0x8   :  { %p137_p4 = pnand %p136_p3, %p130_p0 }
   0xa   :  { %140 = shalt.err (!%p137_p4)
}
   0xb   :  { %s166_s15 = smov 128   ;;  %s167_s16 = smov 8  }
   0xc   :  { %21 = dma.hbm_to_vmem [thread:$0]  %s207_s0, 256, %s16_s13, [#allocation3], %s166_s15, %s166_s15, %s167_s16  }
   0xd   :  { %161 = dma.done.wait [#allocation3], 256  }
   0xe   :  { %162 = vsyncadd [#allocation3], 4294967040  ;;  %vm31_vm0 = vcmask 261120   ;;  %v29_v0 = vld [vmem:[#allocation2] sm:$0xff]  ;;  %v30_v1 = vld [vmem:[#allocation2 + $0x8] sm:$0xff]  ;;  %vm85_vm1 = vcmask 257024  }
   0xf   :  { %v32_v2 = vsel %vm31_vm0, %v29_v0, 0.0  ;;  %v35_v3 = vsel %vm31_vm0, %v30_v1, 0.0  ;;  %v105_v21 = vld [vmem:[%s208_s1] ss:$0 sm:$0xff]  ;;  %s168_s22 = smov [#allocation5]  }
  0x10   :  { %33 = vadd.xlane.f32.xlu0 %v32_v2  ;;  %v106_v23 = vld [vmem:[%s209_s2] ss:$0 sm:$0xff]  ;;  %s93_s23 = sshll.u32 %s168_s22, 4  ;;  %s94_s23 = int_to_ptr.vmem [resolvable:$true] %s93_s23 }
  0x11   :  { %s141_s1 = scalar_lea.vmem %s94_s23, 128  ;;  %p146_p6 = scmp.lt.s32.totalorder %s94_s23, %s94_s23 }
  0x12   :  { %p142_p5 = scmp.ne.s32.totalorder %s94_s23, %s141_s1  ;;  %p147_p7 = scmp.lt.s32.totalorder %s141_s1, %s141_s1 }
  0x14   :  { %36 = vadd.xlane.f32.xlu0 %v35_v3  ;;  %p148_p8 = por %p147_p7, %p146_p6 }
  0x16   :  { %p149_p9 = pnand %p148_p8, %p142_p5 }
  0x99   :  { %v34_v4 = vpop.xlane.xlu0 %33 }
  0x9a   :  { %v39_v5 = vmul.f32 0.03125, %v34_v4 }
  0x9c   :  { %v41_v6 = vsub.f32 %v29_v0, %v39_v5 }
  0x9d   :  { %v37_v7 = vpop.xlane.xlu0 %36 }
  0x9e   :  { %v40_v8 = vmul.f32 0.03125, %v37_v7  ;;  %v43_v9 = vmul.f32 %v41_v6, %v41_v6 }
  0xa0   :  { %v42_v10 = vsub.f32 %v30_v1, %v40_v8  ;;  %v45_v11 = vsel %vm31_vm0, %v43_v9, 0.0 }
  0xa1   :  { %46 = vadd.xlane.f32.xlu1 %v45_v11 }
  0xa2   :  { %v44_v12 = vmul.f32 %v42_v10, %v42_v10 }
  0xa4   :  { %v48_v13 = vsel %vm31_vm0, %v44_v12, 0.0 }
  0xa5   :  { %49 = vadd.xlane.f32.xlu1 %v48_v13 }
 0x12a   :  { %v47_v14 = vpop.xlane.xlu1 %46 }
 0x12b   :  { %v51_v15 = vmul.f32 0.03125, %v47_v14 }
 0x12d   :  { %v53_v16 = vadd.f32 1e-12, %v51_v15 }
 0x12e   :  { %v50_v17 = vpop.xlane.xlu1 %49 }
 0x12f   :  { %117 = vrsqrt.f32 %v53_v16  ;;  %v52_v18 = vmul.f32 0.03125, %v50_v17 }
 0x131   :  { %v54_v19 = vadd.f32 1e-12, %v52_v18 }
 0x133   :  { %119 = vrsqrt.f32 %v54_v19 }
 0x13c   :  { %v118_v20 = vpop.eup %117 }
 0x13d   :  { %v57_v22 = vmul.f32 %v118_v20, %v41_v6 }
 0x13f   :  { %v66_v24 = vmul.f32 %v105_v21, %v57_v22 }
 0x140   :  { %v120_v25 = vpop.eup %119 }
 0x141   :  { %v58_v26 = vmul.f32 %v120_v25, %v42_v10  ;;  %v75_v27 = vadd.f32 %v106_v23, %v66_v24 }
 0x143   :  { %v67_v28 = vmul.f32 %v105_v21, %v58_v26  ;;  %v109_v29 = vpack.c.bf16 %v75_v27, %v75_v27 }
 0x145   :  { %v76_v30 = vadd.f32 %v106_v23, %v67_v28  ;;  %86 = vst.msk [vmem:[#allocation5] sm:$0xf] %vm85_vm1, %v109_v29 }
 0x147   :  { %v110_v31 = vpack.c.bf16 %v76_v30, %v76_v30 }
 0x149   :  { %87 = vst.msk [vmem:[#allocation5 + $0x4] sm:$0xf] %vm85_vm1, %v110_v31 }
 0x14a   :  { %152 = shalt.err (!%p149_p9)
}
 0x14b   :  { %s169_s2 = smov 64   ;;  %s170_s24 = smov 4  }
 0x14c   :  { %99 = dma.vmem_to_hbm [thread:$0]  %s94_s23, 128, %s210_s3, [#allocation4], %s169_s2, %s169_s2, %s170_s24  }
 0x14d   :  { %163 = dma.done.wait [#allocation4], 128  }
 0x14e   :  { %164 = vsyncadd [#allocation4], 4294967168 }
 0x14f   :  { %103 = vsyncpa [#allocation3], 1 }
 0x150   :  { %104 = vsyncpa [#allocation4], 1 }

</bundles_post_ra>
